<compile_context>
chip_gen: v6e
topology: v6e:2x2x1
jax: 0.10.0
libtpu: 0.0.40
codegen_flags: <defaults>
</compile_context>

<pallas_src>
import functools

import jax
import jax.numpy as jnp
from jax import lax
from jax.experimental import pallas as pl
from jax.experimental.pallas import tpu as pltpu

LN_EPS = 1e-5  # PyTorch nn.LayerNorm default


def _round_up(n, m):
    return ((n + m - 1) // m) * m


def _pad2(a, rows, cols):
    r, c = a.shape
    return jnp.pad(a, ((0, rows - r), (0, cols - c)))


def _ln_relu_bf16(h, gamma, beta, true_n):
    """LayerNorm over the true feature width + ReLU, output cast to bf16 once.

    `h` may be lane-padded with zeros beyond `true_n`; gamma/beta are zero on
    pad lanes, so padded outputs are exactly 0 after the affine + ReLU.
    """
    inv_n = jnp.float32(1.0 / true_n)
    s1 = jnp.sum(h, axis=-1, keepdims=True)          # independent reductions
    s2 = jnp.sum(h * h, axis=-1, keepdims=True)      # (no mu dependency)
    mu = s1 * inv_n
    var = jnp.maximum(s2 * inv_n - mu * mu, 0.0)
    y = (h - mu) * lax.rsqrt(var + LN_EPS) * gamma + beta
    return jnp.maximum(y, 0.0).astype(jnp.bfloat16)


def actor_kernel(x_ref,
                 w1_ref, b1_ref, g1_ref, be1_ref,
                 w2_ref, b2_ref, g2_ref, be2_ref,
                 w3_ref, b3_ref,
                 out_ref, *, h1_true, h2_true):
    x = x_ref[...]  # bf16 (tb, in_dim)

    # Layer 1: Linear -> LayerNorm -> ReLU   (bf16 MXU, f32 accumulate)
    h1 = jnp.dot(x, w1_ref[...], preferred_element_type=jnp.float32) + b1_ref[...]
    h1 = _ln_relu_bf16(h1, g1_ref[...], be1_ref[...], h1_true)

    # Layer 2: Linear -> LayerNorm -> ReLU
    h2 = jnp.dot(h1, w2_ref[...], preferred_element_type=jnp.float32) + b2_ref[...]
    h2 = _ln_relu_bf16(h2, g2_ref[...], be2_ref[...], h2_true)

    # Output layer: Linear -> Tanh, stored into a lane-dense 128-wide slab
    # (pad columns of w3/b3 are zero -> tanh(0)=0 on pad lanes, sliced off in
    # the wrapper).
    out_ref[...] = jnp.tanh(
        jnp.dot(h2, w3_ref[...], preferred_element_type=jnp.float32) + b3_ref[...])


def actor_forward(x, params, *, block_batch=512, min_grid_steps=None):
    (w1, b1, g1, be1, w2, b2, g2, be2, w3, b3) = params
    batch, in_dim = x.shape
    h1 = w1.shape[1]
    h2 = w2.shape[1]
    act_dim = w3.shape[1]

    # Lane-aligned padded widths.
    h1p = _round_up(h1, 128)
    h2p = _round_up(h2, 128)
    out_p = _round_up(max(act_dim, 128), 128)

    # Pad weights / params with zeros; weights go to bf16 (halves HBM traffic,
    # 2x MXU throughput).  Biases / LN params / output stay f32.
    w1p = _pad2(w1, in_dim, h1p).astype(jnp.bfloat16)
    w2p = _pad2(w2, h1p, h2p).astype(jnp.bfloat16)
    w3p = _pad2(w3, h2p, out_p).astype(jnp.bfloat16)
    b1p = _pad2(b1, 1, h1p)
    g1p = _pad2(g1, 1, h1p)
    be1p = _pad2(be1, 1, h1p)
    b2p = _pad2(b2, 1, h2p)
    g2p = _pad2(g2, 1, h2p)
    be2p = _pad2(be2, 1, h2p)
    b3p = _pad2(b3, 1, out_p)

    # Cast activations to bf16 exactly once, at the wrapper.
    x = x.astype(jnp.bfloat16)

    # Batch tiling.  The kernel is overhead/latency-bound, so prefer covering
    # the batch in 1-2 big grid steps.  On v7x, keep >=2 "parallel" steps so
    # both TensorCores get work (when the batch is large enough to split).
    if min_grid_steps is None:
        kind = getattr(jax.devices()[0], "device_kind", "") or ""
        min_grid_steps = 2 if "v7" in kind.lower() else 1
    rows = _round_up(batch, 8)
    steps = min_grid_steps if rows >= 8 * min_grid_steps else 1
    tb = min(block_batch, _round_up(pl.cdiv(rows, steps), 8))
    padded_batch = _round_up(batch, tb)
    if padded_batch != batch:
        x = jnp.pad(x, ((0, padded_batch - batch), (0, 0)))
    grid = (padded_batch // tb,)

    def const_spec(p):
        # Full-array block + constant index map -> VMEM-resident across all
        # grid steps (fetched once, no re-DMA).
        return pl.BlockSpec(p.shape, lambda i: (0, 0))

    kernel = functools.partial(actor_kernel, h1_true=h1, h2_true=h2)

    out = pl.pallas_call(
        kernel,
        out_shape=jax.ShapeDtypeStruct((padded_batch, out_p), jnp.float32),
        grid=grid,
        in_specs=[pl.BlockSpec((tb, in_dim), lambda i: (i, 0))]
                 + [const_spec(p) for p in
                    (w1p, b1p, g1p, be1p, w2p, b2p, g2p, be2p, w3p, b3p)],
        out_specs=pl.BlockSpec((tb, out_p), lambda i: (i, 0)),
        compiler_params=pltpu.CompilerParams(
            dimension_semantics=("parallel",),
            vmem_limit_bytes=32 * 1024 * 1024),
    )(x, w1p, b1p, g1p, be1p, w2p, b2p, g2p, be2p, w3p, b3p)

    return out[:batch, :act_dim]


def init_actor_params(key, in_dim, act_dim, h1=400, h2=300):
    """Deterministic init mimicking PyTorch nn.Linear defaults."""
    ks = jax.random.split(key, 6)

    def lin(kw, kb, fan_in, fan_out):
        bound = 1.0 / jnp.sqrt(float(fan_in))
        w = jax.random.uniform(kw, (fan_in, fan_out), jnp.float32, -bound, bound)
        b = jax.random.uniform(kb, (1, fan_out), jnp.float32, -bound, bound)
        return w, b

    w1, b1 = lin(ks[0], ks[1], in_dim, h1)
    w2, b2 = lin(ks[2], ks[3], h1, h2)
    w3, b3 = lin(ks[4], ks[5], h2, act_dim)
    # LayerNorm: weight=1, bias=0 (PyTorch default)
    g1 = jnp.ones((1, h1), jnp.float32)
    be1 = jnp.zeros((1, h1), jnp.float32)
    g2 = jnp.ones((1, h2), jnp.float32)
    be2 = jnp.zeros((1, h2), jnp.float32)
    return (w1, b1, g1, be1, w2, b2, g2, be2, w3, b3)


def actor_reference(x, params):
    """Pure-JAX reference mirroring the kernel's bf16 / f32-accumulate math."""
    (w1, b1, g1, be1, w2, b2, g2, be2, w3, b3) = params

    def dot(a, w):
        return jnp.dot(a, w.astype(jnp.bfloat16),
                       preferred_element_type=jnp.float32)

    def ln_relu(h, g, be):
        mu = jnp.mean(h, axis=-1, keepdims=True)
        var = jnp.maximum(jnp.mean(h * h, axis=-1, keepdims=True) - mu * mu, 0.0)
        y = (h - mu) * lax.rsqrt(var + LN_EPS) * g + be
        return jnp.maximum(y, 0.0).astype(jnp.bfloat16)

    xb = x.astype(jnp.bfloat16)
    h = ln_relu(dot(xb, w1) + b1, g1, be1)
    h = ln_relu(dot(h, w2) + b2, g2, be2)
    return jnp.tanh(dot(h, w3) + b3)


if __name__ == "__main__":
    key = jax.random.PRNGKey(0)
    k_param, k_x = jax.random.split(key)

    # Small shapes consistent with Actor(input_shape=(16,), action_shape=(4,))
    batch, in_dim, act_dim = 8, 16, 4
    params = init_actor_params(k_param, in_dim, act_dim)
    x = jax.random.normal(k_x, (batch, in_dim), jnp.float32)

    out = actor_forward(x, params)
    out = jax.block_until_ready(out)

    ref = actor_reference(x, params)
    assert out.shape == (batch, act_dim)
    assert jnp.allclose(out, ref, atol=2e-3, rtol=2e-3), "mismatch vs reference"

    print("KERNEL_OK")
</pallas_src>

<mosaic_0001>
module attributes {stable_mosaic.version = 11 : i64} {
  func.func @actor_kernel(%arg0: i32, %arg1: memref<8x16xbf16, #tpu.memory_space<vmem>>, %arg2: memref<16x512xbf16, #tpu.memory_space<vmem>>, %arg3: memref<1x512xf32, #tpu.memory_space<vmem>>, %arg4: memref<1x512xf32, #tpu.memory_space<vmem>>, %arg5: memref<1x512xf32, #tpu.memory_space<vmem>>, %arg6: memref<512x384xbf16, #tpu.memory_space<vmem>>, %arg7: memref<1x384xf32, #tpu.memory_space<vmem>>, %arg8: memref<1x384xf32, #tpu.memory_space<vmem>>, %arg9: memref<1x384xf32, #tpu.memory_space<vmem>>, %arg10: memref<384x128xbf16, #tpu.memory_space<vmem>>, %arg11: memref<1x128xf32, #tpu.memory_space<vmem>>, %arg12: memref<8x128xf32, #tpu.memory_space<vmem>>) attributes {dimension_semantics = [#tpu.dimension_semantics<parallel>], iteration_bounds = array<i64: 1>, scalar_prefetch = 0 : i64, scratch_operands = 0 : i64, tpu.core_type = #tpu.core_type<tc>, window_params = [{transform_indices = @transform_0, window_bounds = array<i64: 8, 16>}, {pipeline_mode = #tpu.pipeline_mode<synchronous>, transform_indices = @transform_1, window_bounds = array<i64: 16, 512>}, {pipeline_mode = #tpu.pipeline_mode<synchronous>, transform_indices = @transform_2, window_bounds = array<i64: 1, 512>}, {pipeline_mode = #tpu.pipeline_mode<synchronous>, transform_indices = @transform_3, window_bounds = array<i64: 1, 512>}, {pipeline_mode = #tpu.pipeline_mode<synchronous>, transform_indices = @transform_4, window_bounds = array<i64: 1, 512>}, {pipeline_mode = #tpu.pipeline_mode<synchronous>, transform_indices = @transform_5, window_bounds = array<i64: 512, 384>}, {pipeline_mode = #tpu.pipeline_mode<synchronous>, transform_indices = @transform_6, window_bounds = array<i64: 1, 384>}, {pipeline_mode = #tpu.pipeline_mode<synchronous>, transform_indices = @transform_7, window_bounds = array<i64: 1, 384>}, {pipeline_mode = #tpu.pipeline_mode<synchronous>, transform_indices = @transform_8, window_bounds = array<i64: 1, 384>}, {pipeline_mode = #tpu.pipeline_mode<synchronous>, transform_indices = @transform_9, window_bounds = array<i64: 384, 128>}, {pipeline_mode = #tpu.pipeline_mode<synchronous>, transform_indices = @transform_10, window_bounds = array<i64: 1, 128>}, {transform_indices = @transform_11, window_bounds = array<i64: 8, 128>}]} {
    %c0 = arith.constant 0 : index
    %c0_0 = arith.constant 0 : index
    %0 = vector.load %arg1[%c0, %c0_0] : memref<8x16xbf16, #tpu.memory_space<vmem>>, vector<8x16xbf16>
    %c0_1 = arith.constant 0 : index
    %c0_2 = arith.constant 0 : index
    %1 = vector.load %arg2[%c0_1, %c0_2] : memref<16x512xbf16, #tpu.memory_space<vmem>>, vector<16x512xbf16>
    %cst = arith.constant dense<0.000000e+00> : vector<8x512xf32>
    %2 = tpu.matmul %0, %1, %cst {dimension_numbers = #tpu.dot_dimension_numbers<[1], [0], [0], [1], [0, 0, 1, 1], [], []>} : vector<8x16xbf16>, vector<16x512xbf16>, vector<8x512xf32> -> vector<8x512xf32>
    %c0_3 = arith.constant 0 : index
    %c0_4 = arith.constant 0 : index
    %3 = vector.load %arg3[%c0_3, %c0_4] : memref<1x512xf32, #tpu.memory_space<vmem>>, vector<1x512xf32>
    %4 = vector.broadcast %3 : vector<1x512xf32> to vector<8x512xf32>
    %5 = arith.addf %2, %4 : vector<8x512xf32>
    %c0_5 = arith.constant 0 : index
    %c0_6 = arith.constant 0 : index
    %6 = vector.load %arg4[%c0_5, %c0_6] : memref<1x512xf32, #tpu.memory_space<vmem>>, vector<1x512xf32>
    %c0_7 = arith.constant 0 : index
    %c0_8 = arith.constant 0 : index
    %7 = vector.load %arg5[%c0_7, %c0_8] : memref<1x512xf32, #tpu.memory_space<vmem>>, vector<1x512xf32>
    %cst_9 = arith.constant dense<0.000000e+00> : vector<8xf32>
    %8 = vector.multi_reduction <add>, %5, %cst_9 [1] : vector<8x512xf32> to vector<8xf32>
    %9 = vector.shape_cast %8 : vector<8xf32> to vector<8x1xf32>
    %10 = arith.mulf %5, %5 : vector<8x512xf32>
    %cst_10 = arith.constant dense<0.000000e+00> : vector<8xf32>
    %11 = vector.multi_reduction <add>, %10, %cst_10 [1] : vector<8x512xf32> to vector<8xf32>
    %12 = vector.shape_cast %11 : vector<8xf32> to vector<8x1xf32>
    %cst_11 = arith.constant 2.500000e-03 : f32
    %13 = vector.broadcast %cst_11 : f32 to vector<8x1xf32>
    %14 = arith.mulf %9, %13 : vector<8x1xf32>
    %cst_12 = arith.constant 2.500000e-03 : f32
    %15 = vector.broadcast %cst_12 : f32 to vector<8x1xf32>
    %16 = arith.mulf %12, %15 : vector<8x1xf32>
    %17 = arith.mulf %14, %14 : vector<8x1xf32>
    %18 = arith.subf %16, %17 : vector<8x1xf32>
    %cst_13 = arith.constant 0.000000e+00 : f32
    %19 = vector.broadcast %cst_13 : f32 to vector<8x1xf32>
    %20 = arith.maximumf %18, %19 : vector<8x1xf32>
    %21 = vector.broadcast %14 : vector<8x1xf32> to vector<8x512xf32>
    %22 = arith.subf %5, %21 : vector<8x512xf32>
    %cst_14 = arith.constant 9.99999974E-6 : f32
    %23 = vector.broadcast %cst_14 : f32 to vector<8x1xf32>
    %24 = arith.addf %20, %23 : vector<8x1xf32>
    %25 = math.rsqrt %24 : vector<8x1xf32>
    %26 = vector.broadcast %25 : vector<8x1xf32> to vector<8x512xf32>
    %27 = arith.mulf %22, %26 : vector<8x512xf32>
    %28 = vector.broadcast %6 : vector<1x512xf32> to vector<8x512xf32>
    %29 = arith.mulf %27, %28 : vector<8x512xf32>
    %30 = vector.broadcast %7 : vector<1x512xf32> to vector<8x512xf32>
    %31 = arith.addf %29, %30 : vector<8x512xf32>
    %cst_15 = arith.constant 0.000000e+00 : f32
    %32 = vector.broadcast %cst_15 : f32 to vector<8x512xf32>
    %33 = arith.maximumf %31, %32 : vector<8x512xf32>
    %34 = arith.truncf %33 : vector<8x512xf32> to vector<8x512xbf16>
    %c0_16 = arith.constant 0 : index
    %c0_17 = arith.constant 0 : index
    %35 = vector.load %arg6[%c0_16, %c0_17] : memref<512x384xbf16, #tpu.memory_space<vmem>>, vector<512x384xbf16>
    %cst_18 = arith.constant dense<0.000000e+00> : vector<8x384xf32>
    %36 = tpu.matmul %34, %35, %cst_18 {dimension_numbers = #tpu.dot_dimension_numbers<[1], [0], [0], [1], [0, 0, 1, 1], [], []>} : vector<8x512xbf16>, vector<512x384xbf16>, vector<8x384xf32> -> vector<8x384xf32>
    %c0_19 = arith.constant 0 : index
    %c0_20 = arith.constant 0 : index
    %37 = vector.load %arg7[%c0_19, %c0_20] : memref<1x384xf32, #tpu.memory_space<vmem>>, vector<1x384xf32>
    %38 = vector.broadcast %37 : vector<1x384xf32> to vector<8x384xf32>
    %39 = arith.addf %36, %38 : vector<8x384xf32>
    %c0_21 = arith.constant 0 : index
    %c0_22 = arith.constant 0 : index
    %40 = vector.load %arg8[%c0_21, %c0_22] : memref<1x384xf32, #tpu.memory_space<vmem>>, vector<1x384xf32>
    %c0_23 = arith.constant 0 : index
    %c0_24 = arith.constant 0 : index
    %41 = vector.load %arg9[%c0_23, %c0_24] : memref<1x384xf32, #tpu.memory_space<vmem>>, vector<1x384xf32>
    %cst_25 = arith.constant dense<0.000000e+00> : vector<8xf32>
    %42 = vector.multi_reduction <add>, %39, %cst_25 [1] : vector<8x384xf32> to vector<8xf32>
    %43 = vector.shape_cast %42 : vector<8xf32> to vector<8x1xf32>
    %44 = arith.mulf %39, %39 : vector<8x384xf32>
    %cst_26 = arith.constant dense<0.000000e+00> : vector<8xf32>
    %45 = vector.multi_reduction <add>, %44, %cst_26 [1] : vector<8x384xf32> to vector<8xf32>
    %46 = vector.shape_cast %45 : vector<8xf32> to vector<8x1xf32>
    %cst_27 = arith.constant 0.00333333341 : f32
    %47 = vector.broadcast %cst_27 : f32 to vector<8x1xf32>
    %48 = arith.mulf %43, %47 : vector<8x1xf32>
    %cst_28 = arith.constant 0.00333333341 : f32
    %49 = vector.broadcast %cst_28 : f32 to vector<8x1xf32>
    %50 = arith.mulf %46, %49 : vector<8x1xf32>
    %51 = arith.mulf %48, %48 : vector<8x1xf32>
    %52 = arith.subf %50, %51 : vector<8x1xf32>
    %cst_29 = arith.constant 0.000000e+00 : f32
    %53 = vector.broadcast %cst_29 : f32 to vector<8x1xf32>
    %54 = arith.maximumf %52, %53 : vector<8x1xf32>
    %55 = vector.broadcast %48 : vector<8x1xf32> to vector<8x384xf32>
    %56 = arith.subf %39, %55 : vector<8x384xf32>
    %cst_30 = arith.constant 9.99999974E-6 : f32
    %57 = vector.broadcast %cst_30 : f32 to vector<8x1xf32>
    %58 = arith.addf %54, %57 : vector<8x1xf32>
    %59 = math.rsqrt %58 : vector<8x1xf32>
    %60 = vector.broadcast %59 : vector<8x1xf32> to vector<8x384xf32>
    %61 = arith.mulf %56, %60 : vector<8x384xf32>
    %62 = vector.broadcast %40 : vector<1x384xf32> to vector<8x384xf32>
    %63 = arith.mulf %61, %62 : vector<8x384xf32>
    %64 = vector.broadcast %41 : vector<1x384xf32> to vector<8x384xf32>
    %65 = arith.addf %63, %64 : vector<8x384xf32>
    %cst_31 = arith.constant 0.000000e+00 : f32
    %66 = vector.broadcast %cst_31 : f32 to vector<8x384xf32>
    %67 = arith.maximumf %65, %66 : vector<8x384xf32>
    %68 = arith.truncf %67 : vector<8x384xf32> to vector<8x384xbf16>
    %c0_32 = arith.constant 0 : index
    %c0_33 = arith.constant 0 : index
    %69 = vector.load %arg10[%c0_32, %c0_33] : memref<384x128xbf16, #tpu.memory_space<vmem>>, vector<384x128xbf16>
    %cst_34 = arith.constant dense<0.000000e+00> : vector<8x128xf32>
    %70 = tpu.matmul %68, %69, %cst_34 {dimension_numbers = #tpu.dot_dimension_numbers<[1], [0], [0], [1], [0, 0, 1, 1], [], []>} : vector<8x384xbf16>, vector<384x128xbf16>, vector<8x128xf32> -> vector<8x128xf32>
    %c0_35 = arith.constant 0 : index
    %c0_36 = arith.constant 0 : index
    %71 = vector.load %arg11[%c0_35, %c0_36] : memref<1x128xf32, #tpu.memory_space<vmem>>, vector<1x128xf32>
    %72 = vector.broadcast %71 : vector<1x128xf32> to vector<8x128xf32>
    %73 = arith.addf %70, %72 : vector<8x128xf32>
    %74 = math.tanh %73 : vector<8x128xf32>
    %c0_37 = arith.constant 0 : index
    %c0_38 = arith.constant 0 : index
    %75 = vector.load %arg12[%c0_37, %c0_38] : memref<8x128xf32, #tpu.memory_space<vmem>>, vector<8x128xf32>
    tpu.vector_store %arg12[%c0_37, %c0_38], %74 {strides = array<i32>} : memref<8x128xf32, #tpu.memory_space<vmem>>, vector<8x128xf32>,
    return
  }
  func.func @transform_0(%arg0: i32) -> (i32, i32) {
    %c0_i32 = arith.constant 0 : i32
    %c0_i32_0 = arith.constant 0 : i32
    return %arg0, %c0_i32 : i32, i32
  }
  func.func @transform_1(%arg0: i32) -> (i32, i32) {
    %c0_i32 = arith.constant 0 : i32
    %c0_i32_0 = arith.constant 0 : i32
    %c0_i32_1 = arith.constant 0 : i32
    return %c0_i32, %c0_i32_0 : i32, i32
  }
  func.func @transform_2(%arg0: i32) -> (i32, i32) {
    %c0_i32 = arith.constant 0 : i32
    %c0_i32_0 = arith.constant 0 : i32
    %c0_i32_1 = arith.constant 0 : i32
    return %c0_i32, %c0_i32_0 : i32, i32
  }
  func.func @transform_3(%arg0: i32) -> (i32, i32) {
    %c0_i32 = arith.constant 0 : i32
    %c0_i32_0 = arith.constant 0 : i32
    %c0_i32_1 = arith.constant 0 : i32
    return %c0_i32, %c0_i32_0 : i32, i32
  }
  func.func @transform_4(%arg0: i32) -> (i32, i32) {
    %c0_i32 = arith.constant 0 : i32
    %c0_i32_0 = arith.constant 0 : i32
    %c0_i32_1 = arith.constant 0 : i32
    return %c0_i32, %c0_i32_0 : i32, i32
  }
  func.func @transform_5(%arg0: i32) -> (i32, i32) {
    %c0_i32 = arith.constant 0 : i32
    %c0_i32_0 = arith.constant 0 : i32
    %c0_i32_1 = arith.constant 0 : i32
    return %c0_i32, %c0_i32_0 : i32, i32
  }
  func.func @transform_6(%arg0: i32) -> (i32, i32) {
    %c0_i32 = arith.constant 0 : i32
    %c0_i32_0 = arith.constant 0 : i32
    %c0_i32_1 = arith.constant 0 : i32
    return %c0_i32, %c0_i32_0 : i32, i32
  }
  func.func @transform_7(%arg0: i32) -> (i32, i32) {
    %c0_i32 = arith.constant 0 : i32
    %c0_i32_0 = arith.constant 0 : i32
    %c0_i32_1 = arith.constant 0 : i32
    return %c0_i32, %c0_i32_0 : i32, i32
  }
  func.func @transform_8(%arg0: i32) -> (i32, i32) {
    %c0_i32 = arith.constant 0 : i32
    %c0_i32_0 = arith.constant 0 : i32
    %c0_i32_1 = arith.constant 0 : i32
    return %c0_i32, %c0_i32_0 : i32, i32
  }
  func.func @transform_9(%arg0: i32) -> (i32, i32) {
    %c0_i32 = arith.constant 0 : i32
    %c0_i32_0 = arith.constant 0 : i32
    %c0_i32_1 = arith.constant 0 : i32
    return %c0_i32, %c0_i32_0 : i32, i32
  }
  func.func @transform_10(%arg0: i32) -> (i32, i32) {
    %c0_i32 = arith.constant 0 : i32
    %c0_i32_0 = arith.constant 0 : i32
    %c0_i32_1 = arith.constant 0 : i32
    return %c0_i32, %c0_i32_0 : i32, i32
  }
  func.func @transform_11(%arg0: i32) -> (i32, i32) {
    %c0_i32 = arith.constant 0 : i32
    %c0_i32_0 = arith.constant 0 : i32
    return %arg0, %c0_i32 : i32, i32
  }
}

</mosaic_0001>

<bundles_post_ra>
// kernel: tpu_custom_call.1
= control target key start
LH: loop header
LB: loop body
LE: loop exit
PB: predicated region body
PF: predicated region fallthrough
CT: control target
= control target key end

     0   :  { %16 = vsyncpa [#allocation3], 0  ;;  %s2269_s0 = inlined_call_operand.hbm [shape: bf16[8,16], index: 0, kind: input, shape index: {}]   ;;  %s2270_s1 = inlined_call_operand.hbm [shape: bf16[16,512], index: 1, kind: input, shape index: {}]   ;;  %s2271_s2 = inlined_call_operand.hbm [shape: f32[1,512], index: 2, kind: input, shape index: {}]   ;;  %s2272_s3 = inlined_call_operand.vmem [shape: f32[1,512], index: 3, kind: input, shape index: {}]   ;;  %s2273_s4 = inlined_call_operand.hbm [shape: f32[1,512], index: 4, kind: input, shape index: {}]   ;;  %s2274_s5 = inlined_call_operand.hbm [shape: bf16[512,384], index: 5, kind: input, shape index: {}]   ;;  %s2275_s6 = inlined_call_operand.vmem [shape: f32[1,384], index: 6, kind: input, shape index: {}]   ;;  %s2276_s7 = inlined_call_operand.vmem [shape: f32[1,384], index: 7, kind: input, shape index: {}]   ;;  %s2277_s8 = inlined_call_operand.vmem [shape: f32[1,384], index: 8, kind: input, shape index: {}]   ;;  %s2278_s9 = inlined_call_operand.hbm [shape: bf16[384,128], index: 9, kind: input, shape index: {}]   ;;  %s2279_s10 = inlined_call_operand.vmem [shape: f32[1,128], index: 10, kind: input, shape index: {}]   ;;  %s2280_s11 = inlined_call_operand.hbm [shape: f32[8,128], index: 11, kind: output, shape index: {}]  }
   0x1   :  { %17 = vsyncpa [#allocation6], 0 }
   0x2   :  { %18 = vsyncpa [#allocation9], 0 }
   0x3   :  { %19 = vsyncpa [#allocation12], 0 }
   0x4   :  { %20 = vsyncpa [#allocation4], 0  ;;  %s2078_s17 = smov [#allocation5]  }
   0x5   :  { %s36_s18 = sshll.u32 %s2078_s17, 4  ;;  %s37_s18 = int_to_ptr.vmem [resolvable:$true] %s36_s18 }
   0x6   :  { %s1936_s19 = scalar_lea.vmem %s37_s18, 512  ;;  %p1941_p1 = scmp.lt.s32.totalorder %s37_s18, %s37_s18 }
   0x7   :  { %p1937_p0 = scmp.ne.s32.totalorder %s37_s18, %s1936_s19  ;;  %p1942_p2 = scmp.lt.s32.totalorder %s1936_s19, %s1936_s19 }
   0x9   :  { %p1943_p3 = por %p1942_p2, %p1941_p1 }
   0xb   :  { %p1944_p4 = pnand %p1943_p3, %p1937_p0 }
   0xd   :  { %1947 = shalt.err (!%p1944_p4)
}
   0xe   :  { %s2079_s20 = smov 256   ;;  %s2080_s21 = smov 16  }
   0xf   :  { %42 = dma.hbm_to_vmem [thread:$0]  %s2270_s1, 512, %s37_s18, [#allocation6], %s2079_s20, %s2079_s20, %s2080_s21  }
  0x10   :  { %s2081_s24 = smov [#allocation8]   ;;  %s2082_s26 = smov [#allocation2]  }
  0x11   :  { %s61_s25 = sshll.u32 %s2081_s24, 4  ;;  %s27_s27 = sshll.u32 %s2082_s26, 4  ;;  %s62_s25 = int_to_ptr.vmem [resolvable:$true] %s61_s25  ;;  %s28_s27 = int_to_ptr.vmem [resolvable:$true] %s27_s27 }
  0x12   :  { %s1956_s28 = scalar_lea.vmem %s62_s25, 64  ;;  %p1961_p6 = scmp.lt.s32.totalorder %s62_s25, %s62_s25 }
  0x13   :  { %p1957_p5 = scmp.ne.s32.totalorder %s62_s25, %s1956_s28  ;;  %p1962_p7 = scmp.lt.s32.totalorder %s1956_s28, %s1956_s28 }
  0x15   :  { %p1963_p8 = por %p1962_p7, %p1961_p6 }
  0x17   :  { %p1964_p9 = pnand %p1963_p8, %p1957_p5 }
  0x19   :  { %1967 = shalt.err (!%p1964_p9)
}
  0x1a   :  { %64 = dma.hbm_to_vmem [thread:$0]  %s2273_s4, 64, %s62_s25, [#allocation9]  }
  0x1b   :  { %s1976_s12 = scalar_lea.vmem %s28_s27, 64  ;;  %p1981_p11 = scmp.lt.s32.totalorder %s28_s27, %s28_s27 }
  0x1c   :  { %p1977_p10 = scmp.ne.s32.totalorder %s28_s27, %s1976_s12  ;;  %p1982_p12 = scmp.lt.s32.totalorder %s1976_s12, %s1976_s12 }
  0x1e   :  { %p1983_p13 = por %p1982_p12, %p1981_p11 }
  0x20   :  { %p1984_p0 = pnand %p1983_p13, %p1977_p10 }
  0x22   :  { %1987 = shalt.err (!%p1984_p0)
}
  0x23   :  { %30 = dma.hbm_to_vmem [thread:$0]  %s2269_s0, 64, %s28_s27, [#allocation3]  }
  0x24   :  { %s2083_s14 = smov [#allocation7]   ;;  %s2084_s16 = smov [#allocation10]  }
  0x25   :  { %s49_s15 = sshll.u32 %s2083_s14, 4  ;;  %s70_s17 = sshll.u32 %s2084_s16, 4  ;;  %s50_s15 = int_to_ptr.vmem [resolvable:$true] %s49_s15  ;;  %s71_s17 = int_to_ptr.vmem [resolvable:$true] %s70_s17 }
  0x26   :  { %s1996_s18 = scalar_lea.vmem %s50_s15, 64  ;;  %p2001_p2 = scmp.lt.s32.totalorder %s50_s15, %s50_s15 }
  0x27   :  { %p1997_p1 = scmp.ne.s32.totalorder %s50_s15, %s1996_s18  ;;  %p2002_p3 = scmp.lt.s32.totalorder %s1996_s18, %s1996_s18 }
  0x29   :  { %p2003_p4 = por %p2002_p3, %p2001_p2 }
  0x2b   :  { %p2004_p5 = pnand %p2003_p4, %p1997_p1 }
  0x2d   :  { %2007 = shalt.err (!%p2004_p5)
}
  0x2e   :  { %52 = dma.hbm_to_vmem [thread:$0]  %s2271_s2, 64, %s50_s15, [#allocation6]  }
  0x2f   :  { %s2016_s20 = scalar_lea.vmem %s71_s17, 12288  ;;  %p2021_p7 = scmp.lt.s32.totalorder %s71_s17, %s71_s17 }
  0x30   :  { %p2017_p6 = scmp.ne.s32.totalorder %s71_s17, %s2016_s20  ;;  %p2022_p8 = scmp.lt.s32.totalorder %s2016_s20, %s2016_s20 }
  0x32   :  { %p2023_p9 = por %p2022_p8, %p2021_p7 }
  0x34   :  { %p2024_p10 = pnand %p2023_p9, %p2017_p6 }
  0x36   :  { %2027 = shalt.err (!%p2024_p10)
}
  0x37   :  { %s2085_s0 = smov 192   ;;  %s2086_s21 = smov 12  }
  0x38   :  { %76 = dma.hbm_to_vmem [thread:$0]  %s2274_s5, 12288, %s71_s17, [#allocation9], %s2085_s0, %s2085_s0, %s2086_s21  }
  0x39   :  { %s2087_s24 = smov [#allocation11]  }
  0x3a   :  { %s88_s25 = sshll.u32 %s2087_s24, 4  ;;  %s89_s25 = int_to_ptr.vmem [resolvable:$true] %s88_s25 }
  0x3b   :  { %s2036_s26 = scalar_lea.vmem %s89_s25, 3072  ;;  %p2041_p12 = scmp.lt.s32.totalorder %s89_s25, %s89_s25 }
  0x3c   :  { %p2037_p11 = scmp.ne.s32.totalorder %s89_s25, %s2036_s26  ;;  %p2042_p13 = scmp.lt.s32.totalorder %s2036_s26, %s2036_s26 }
  0x3e   :  { %p2043_p0 = por %p2042_p13, %p2041_p12 }
  0x40   :  { %p2044_p1 = pnand %p2043_p0, %p2037_p11 }
  0x42   :  { %2047 = shalt.err (!%p2044_p1)
}
  0x43   :  { %s2088_s2 = smov 64   ;;  %s2089_s27 = smov 4  }
  0x44   :  { %94 = dma.hbm_to_vmem [thread:$0]  %s2278_s9, 3072, %s89_s25, [#allocation12], %s2088_s2, %s2088_s2, %s2089_s27  }
  0x45   :  { %2068 = dma.done.wait [#allocation3], 64  }
  0x46   :  { %2069 = vsyncadd [#allocation3], 4294967232 }
  0x47   :  { %2070 = dma.done.wait [#allocation6], 576  }
  0x48   :  { %2071 = vsyncadd [#allocation6], 4294966720 }
  0x49   :  { %2072 = dma.done.wait [#allocation9], 12352  }
  0x4a   :  { %2073 = vsyncadd [#allocation9], 4294954944 }
  0x4b   :  { %2074 = dma.done.wait [#allocation12], 3072  }
  0x4c   :  { %2075 = vsyncadd [#allocation12], 4294964224  ;;  %v2090_v0 = vmov 0   ;;  %v1764_v1 = vld [vmem:[#allocation5 + $0x4] ss:$16 sps:$4 sm:$0xff]   ;;  %vm163_vm0 = vcmask 130048   ;;  %v123_v34 = vlaneseq }
  0x4d   :  { %199 = vmatprep.mubr.bf16.mxu0 %v2090_v0  ;;  %240 = vmatprep.mubr.bf16.mxu1 %v2090_v0  ;;  %v1766_v2 = vld [vmem:[#allocation5 + $0xc] ss:$16 sps:$4 sm:$0xff]   ;;  %v1768_v3 = vld [vmem:[#allocation5] ss:$16 sps:$4 sm:$0xff]   ;;  %v1769_v4 = vld [vmem:[#allocation5 + $0x8] ss:$16 sps:$4 sm:$0xff]  }
  0x4e   :  { %181 = vmatprep.subr.bf16.mxu0 %v1764_v1  ;;  %222 = vmatprep.subr.bf16.mxu1 %v1766_v2  ;;  %v116_v5 = vld [vmem:[#allocation2] sm:$0xf]  ;;  %v1772_v7 = vld [vmem:[#allocation10 + $0xac] ss:$12 sps:$4 sm:$0xff]   ;;  %v1776_v12 = vld [vmem:[#allocation10 + $0x90] ss:$12 sps:$4 sm:$0xff]  }
  0x4f   :  { %182 = vmatpush1.bf16.msra.mxu0 %v1768_v3  ;;  %223 = vmatpush1.bf16.msra.mxu1 %v1769_v4  ;;  %v1770_v6 = vld [vmem:[#allocation10 + $0xa8] ss:$12 sps:$4 sm:$0xff]   ;;  %v1775_v9 = vld [vmem:[#allocation10 + $0x22c] ss:$12 sps:$4 sm:$0xff]   ;;  %v1779_v13 = vld [vmem:[#allocation10 + $0x210] ss:$12 sps:$4 sm:$0xff]  }
  0x50   :  { %v1773_v8 = vld [vmem:[#allocation10 + $0x228] ss:$12 sps:$4 sm:$0xff]   ;;  %995 = vmatprep.subr.bf16.mxu0 %v1772_v7  ;;  %1036 = vmatprep.subr.bf16.mxu1 %v1775_v9  ;;  %v1782_v16 = vld [vmem:[#allocation10 + $0x78] ss:$12 sps:$4 sm:$0xff]   ;;  %v1788_v20 = vld [vmem:[#allocation10 + $0x60] ss:$12 sps:$4 sm:$0xff]  }
  0x51   :  { %v1778_v10 = vld [vmem:[#allocation10 + $0x94] ss:$12 sps:$4 sm:$0xff]   ;;  %v1784_v14 = vld [vmem:[#allocation10 + $0x7c] ss:$12 sps:$4 sm:$0xff]   ;;  %v1785_v17 = vld [vmem:[#allocation10 + $0x1f8] ss:$12 sps:$4 sm:$0xff]  }
  0x52   :  { %1530 = vmatmul.mubr.msk.bf16.vlgmr.msra.gmra.mxu0 %vm163_vm0, %v116_v5  ;;  %1531 = vmatmul.mubr.msk.bf16.vlgmr.msra.gmra.mxu1 %vm163_vm0, %v116_v5  ;;  %v1781_v11 = vld [vmem:[#allocation10 + $0x214] ss:$12 sps:$4 sm:$0xff]   ;;  %v1787_v15 = vld [vmem:[#allocation10 + $0x1fc] ss:$12 sps:$4 sm:$0xff]   ;;  %v1790_v18 = vld [vmem:[#allocation10 + $0x64] ss:$12 sps:$4 sm:$0xff]  }
  0x53   :  { %996 = vmatpush1.bf16.msra.mxu0 %v1770_v6  ;;  %1037 = vmatpush1.bf16.msra.mxu1 %v1773_v8  ;;  %v1793_v19 = vld [vmem:[#allocation10 + $0x1e4] ss:$12 sps:$4 sm:$0xff]   ;;  %v1791_v21 = vld [vmem:[#allocation10 + $0x1e0] ss:$12 sps:$4 sm:$0xff]   ;;  %v1794_v24 = vld [vmem:[#allocation10 + $0x48] ss:$12 sps:$4 sm:$0xff]  }
  0x54   :  { %997 = vmatprep.subr.bf16.mxu0 %v1778_v10  ;;  %1038 = vmatprep.subr.bf16.mxu1 %v1781_v11  ;;  %v1796_v22 = vld [vmem:[#allocation10 + $0x4c] ss:$12 sps:$4 sm:$0xff]   ;;  %v1797_v25 = vld [vmem:[#allocation10 + $0x1c8] ss:$12 sps:$4 sm:$0xff]   ;;  %v1800_v28 = vld [vmem:[#allocation10 + $0x30] ss:$12 sps:$4 sm:$0xff]  }
  0x55   :  { %v1799_v23 = vld [vmem:[#allocation10 + $0x1cc] ss:$12 sps:$4 sm:$0xff]   ;;  %v1802_v26 = vld [vmem:[#allocation10 + $0x34] ss:$12 sps:$4 sm:$0xff]   ;;  %v1803_v29 = vld [vmem:[#allocation10 + $0x1b0] ss:$12 sps:$4 sm:$0xff]  }
  0x56   :  { %v1805_v27 = vld [vmem:[#allocation10 + $0x1b4] ss:$12 sps:$4 sm:$0xff]   ;;  %v1808_v30 = vld [vmem:[#allocation10 + $0x1c] ss:$12 sps:$4 sm:$0xff]   ;;  %v1806_v32 = vld [vmem:[#allocation10 + $0x18] ss:$12 sps:$4 sm:$0xff]  }
  0x57   :  { %998 = vmatpush1.bf16.msra.mxu0 %v1776_v12  ;;  %1039 = vmatpush1.bf16.msra.mxu1 %v1779_v13  ;;  %v1811_v31 = vld [vmem:[#allocation10 + $0x19c] ss:$12 sps:$4 sm:$0xff]   ;;  %v1809_v33 = vld [vmem:[#allocation10 + $0x198] ss:$12 sps:$4 sm:$0xff]   ;;  %v124_v35 = vshrl.u32 %v123_v34, 7  ;;  %vm2092_vm1 = vmmov 0  }
  0x58   :  { %999 = vmatprep.subr.bf16.mxu0 %v1784_v14  ;;  %1040 = vmatprep.subr.bf16.mxu1 %v1787_v15  ;;  %v121_v38 = vld [vmem:[#allocation7] sm:$0xf]  ;;  %v1814_v3 = vld [vmem:[#allocation10 + $0x4] ss:$12 sps:$4 sm:$0xff]   ;;  %v1812_v5 = vld [vmem:[#allocation10] ss:$12 sps:$4 sm:$0xff]  }
  0x59   :  { %v2172_v36 = vsub.s32 0, %v124_v35  ;;  %v2174_v37 = vsub.s32 2, %v124_v35  ;;  %v2176_v39 = vsub.s32 1, %v124_v35  ;;  %v2181_v43 = vsub.s32 3, %v124_v35  ;;  %v1817_v4 = vld [vmem:[#allocation10 + $0x184] ss:$12 sps:$4 sm:$0xff]  }
  0x5a   :  { %v1815_v6 = vld [vmem:[#allocation10 + $0x180] ss:$12 sps:$4 sm:$0xff]   ;;  %v1818_v9 = vld [vmem:[#allocation10 + $0x168] ss:$12 sps:$4 sm:$0xff]   ;;  %v1824_v13 = vld [vmem:[#allocation10 + $0x150] ss:$12 sps:$4 sm:$0xff]  }
  0x5b   :  { %1000 = vmatpush1.bf16.msra.mxu0 %v1782_v16  ;;  %1041 = vmatpush1.bf16.msra.mxu1 %v1785_v17  ;;  %v126_v40 = vrot.slane %v121_v38, %v2172_v36  ;;  %v134_v41 = vrot.slane %v121_v38, %v2174_v37  ;;  %v130_v42 = vrot.slane %v121_v38, %v2176_v39  ;;  %v1820_v7 = vld [vmem:[#allocation10 + $0x16c] ss:$12 sps:$4 sm:$0xff]   ;;  %v1821_v10 = vld [vmem:[#allocation10 + $0x2e8] ss:$12 sps:$4 sm:$0xff]   ;;  %v1827_v14 = vld [vmem:[#allocation10 + $0x2d0] ss:$12 sps:$4 sm:$0xff]  }
  0x5c   :  { %1001 = vmatprep.subr.bf16.mxu0 %v1790_v18  ;;  %1042 = vmatprep.subr.bf16.mxu1 %v1793_v19  ;;  %v138_v51 = vrot.slane %v121_v38, %v2181_v43  ;;  %v1823_v8 = vld [vmem:[#allocation10 + $0x2ec] ss:$12 sps:$4 sm:$0xff]   ;;  %v1826_v11 = vld [vmem:[#allocation10 + $0x154] ss:$12 sps:$4 sm:$0xff]   ;;  %v1832_v15 = vld [vmem:[#allocation10 + $0x13c] ss:$12 sps:$4 sm:$0xff]  }
  0x5d   :  { %v1829_v12 = vld [vmem:[#allocation10 + $0x2d4] ss:$12 sps:$4 sm:$0xff]   ;;  %v1835_v16 = vld [vmem:[#allocation10 + $0x2bc] ss:$12 sps:$4 sm:$0xff]   ;;  %v1830_v17 = vld [vmem:[#allocation10 + $0x138] ss:$12 sps:$4 sm:$0xff]  }
  0x5e   :  { %v1833_v18 = vld [vmem:[#allocation10 + $0x2b8] ss:$12 sps:$4 sm:$0xff]   ;;  %s2093_s14 = smov [#allocation13]  }
  0x5f   :  { %1002 = vmatpush1.bf16.msra.mxu0 %v1788_v20  ;;  %1043 = vmatpush1.bf16.msra.mxu1 %v1791_v21  ;;  %v1838_v19 = vld [vmem:[#allocation10 + $0x124] ss:$12 sps:$4 sm:$0xff]   ;;  %v1836_v20 = vld [vmem:[#allocation10 + $0x120] ss:$12 sps:$4 sm:$0xff]   ;;  %s1514_s15 = sshll.u32 %s2093_s14, 4  ;;  %s1515_s15 = int_to_ptr.vmem [resolvable:$true] %s1514_s15 }
  0x60   :  { %1003 = vmatprep.subr.bf16.mxu0 %v1796_v22  ;;  %1044 = vmatprep.subr.bf16.mxu1 %v1799_v23  ;;  %v1839_v21 = vld [vmem:[#allocation10 + $0x2a0] ss:$12 sps:$4 sm:$0xff]   ;;  %v1841_v22 = vld [vmem:[#allocation10 + $0x2a4] ss:$12 sps:$4 sm:$0xff]   ;;  %s2048_s16 = scalar_lea.vmem %s1515_s15, 128  ;;  %p2053_p3 = scmp.lt.s32.totalorder %s1515_s15, %s1515_s15 }
  0x61   :  { %v1844_v23 = vld [vmem:[#allocation10 + $0x10c] ss:$12 sps:$4 sm:$0xff]   ;;  %v1862_v35 = vld [vmem:[#allocation10 + $0xc4] ss:$12 sps:$4 sm:$0xff]   ;;  %p2049_p2 = scmp.ne.s32.totalorder %s1515_s15, %s2048_s16  ;;  %p2054_p4 = scmp.lt.s32.totalorder %s2048_s16, %s2048_s16 }
  0x62   :  { %v1857_v34 = vld [vmem:[#allocation10 + $0x258] ss:$12 sps:$4 sm:$0xff]  }
  0x63   :  { %1004 = vmatpush1.bf16.msra.mxu0 %v1794_v24  ;;  %1045 = vmatpush1.bf16.msra.mxu1 %v1797_v25  ;;  %v1847_v24 = vld [vmem:[#allocation10 + $0x28c] ss:$12 sps:$4 sm:$0xff]   ;;  %v1842_v25 = vld [vmem:[#allocation10 + $0x108] ss:$12 sps:$4 sm:$0xff]   ;;  %v1865_v38 = vld [vmem:[#allocation10 + $0x244] ss:$12 sps:$4 sm:$0xff]   ;;  %p2055_p5 = por %p2054_p4, %p2053_p3 }
  0x64   :  { %1005 = vmatprep.subr.bf16.mxu0 %v1802_v26  ;;  %1046 = vmatprep.subr.bf16.mxu1 %v1805_v27  ;;  %v1845_v26 = vld [vmem:[#allocation10 + $0x288] ss:$12 sps:$4 sm:$0xff]  }
  0x65   :  { %v1850_v27 = vld [vmem:[#allocation10 + $0xf4] ss:$12 sps:$4 sm:$0xff]   ;;  %p2056_p6 = pnand %p2055_p5, %p2049_p2 }
  0x67   :  { %1006 = vmatpush1.bf16.msra.mxu0 %v1800_v28  ;;  %1047 = vmatpush1.bf16.msra.mxu1 %v1803_v29  ;;  %v1853_v28 = vld [vmem:[#allocation10 + $0x274] ss:$12 sps:$4 sm:$0xff]   ;;  %v1848_v29 = vld [vmem:[#allocation10 + $0xf0] ss:$12 sps:$4 sm:$0xff]  }
  0x68   :  { %1007 = vmatprep.subr.bf16.mxu0 %v1808_v30  ;;  %1048 = vmatprep.subr.bf16.mxu1 %v1811_v31  ;;  %v1851_v30 = vld [vmem:[#allocation10 + $0x270] ss:$12 sps:$4 sm:$0xff]  }
  0x69   :  { %v1856_v31 = vld [vmem:[#allocation10 + $0xdc] ss:$12 sps:$4 sm:$0xff]  }
  0x6b   :  { %1008 = vmatpush1.bf16.msra.mxu0 %v1806_v32  ;;  %1049 = vmatpush1.bf16.msra.mxu1 %v1809_v33  ;;  %v1859_v32 = vld [vmem:[#allocation10 + $0x25c] ss:$12 sps:$4 sm:$0xff]   ;;  %v1854_v33 = vld [vmem:[#allocation10 + $0xd8] ss:$12 sps:$4 sm:$0xff]  }
  0x6c   :  { %1009 = vmatprep.subr.bf16.mxu0 %v1814_v3  ;;  %1050 = vmatprep.subr.bf16.mxu1 %v1817_v4 }
  0x6f   :  { %1010 = vmatpush1.bf16.msra.mxu0 %v1812_v5  ;;  %1051 = vmatpush1.bf16.msra.mxu1 %v1815_v6 }
  0x70   :  { %1011 = vmatprep.subr.bf16.mxu0 %v1820_v7  ;;  %1052 = vmatprep.subr.bf16.mxu1 %v1823_v8 }
  0x73   :  { %1012 = vmatpush2.bf16.msra.mxu0 %v1818_v9  ;;  %1053 = vmatpush2.bf16.msra.mxu1 %v1821_v10 }
  0x74   :  { %1013 = vmatprep.subr.bf16.mxu0 %v1826_v11  ;;  %1054 = vmatprep.subr.bf16.mxu1 %v1829_v12 }
  0x77   :  { %1014 = vmatpush2.bf16.msra.mxu0 %v1824_v13  ;;  %1055 = vmatpush2.bf16.msra.mxu1 %v1827_v14 }
  0x78   :  { %1015 = vmatprep.subr.bf16.mxu0 %v1832_v15  ;;  %1056 = vmatprep.subr.bf16.mxu1 %v1835_v16 }
  0x7b   :  { %1016 = vmatpush2.bf16.msra.mxu0 %v1830_v17  ;;  %1057 = vmatpush2.bf16.msra.mxu1 %v1833_v18 }
  0x7c   :  { %1017 = vmatprep.subr.bf16.mxu0 %v1838_v19  ;;  %1058 = vmatprep.subr.bf16.mxu1 %v1841_v22 }
  0x7f   :  { %1018 = vmatpush2.bf16.msra.mxu0 %v1836_v20  ;;  %1059 = vmatpush2.bf16.msra.mxu1 %v1839_v21 }
  0x80   :  { %1019 = vmatprep.subr.bf16.mxu0 %v1844_v23  ;;  %1060 = vmatprep.subr.bf16.mxu1 %v1847_v24  ;;  %v1868_v23 = vld [vmem:[#allocation10 + $0xb0] ss:$12 sps:$4 sm:$0xff]  }
  0x81   :  { %v1869_v24 = vld [vmem:[#allocation10 + $0x230] ss:$12 sps:$4 sm:$0xff]  }
  0x83   :  { %1020 = vmatpush2.bf16.msra.mxu0 %v1842_v25  ;;  %1061 = vmatpush2.bf16.msra.mxu1 %v1845_v26  ;;  %v1870_v25 = vld [vmem:[#allocation10 + $0x158] ss:$12 sps:$4 sm:$0xff]  }
  0x84   :  { %1021 = vmatprep.subr.bf16.mxu0 %v1850_v27  ;;  %1062 = vmatprep.subr.bf16.mxu1 %v1853_v28  ;;  %v1871_v26 = vld [vmem:[#allocation10 + $0x2d8] ss:$12 sps:$4 sm:$0xff]  }
  0x85   :  { %v1872_v27 = vld [vmem:[#allocation10 + $0x98] ss:$12 sps:$4 sm:$0xff]  }
  0x86   :  { %v1873_v28 = vld [vmem:[#allocation10 + $0x218] ss:$12 sps:$4 sm:$0xff]  }
  0x87   :  { %1022 = vmatpush2.bf16.msra.mxu0 %v1848_v29  ;;  %1063 = vmatpush2.bf16.msra.mxu1 %v1851_v30  ;;  %v1874_v29 = vld [vmem:[#allocation10 + $0x140] ss:$12 sps:$4 sm:$0xff]  }
  0x88   :  { %1023 = vmatprep.subr.bf16.mxu0 %v1856_v31  ;;  %1064 = vmatprep.subr.bf16.mxu1 %v1859_v32  ;;  %v1875_v30 = vld [vmem:[#allocation10 + $0x2c0] ss:$12 sps:$4 sm:$0xff]  }
  0x89   :  { %v1876_v31 = vld [vmem:[#allocation10 + $0x80] ss:$12 sps:$4 sm:$0xff]  }
  0x8a   :  { %v1877_v32 = vld [vmem:[#allocation10 + $0x200] ss:$12 sps:$4 sm:$0xff]  }
  0x8b   :  { %1024 = vmatpush2.bf16.msra.mxu0 %v1854_v33  ;;  %1065 = vmatpush2.bf16.msra.mxu1 %v1857_v34  ;;  %v1878_v33 = vld [vmem:[#allocation10 + $0x128] ss:$12 sps:$4 sm:$0xff]  }
  0x8c   :  { %1025 = vmatprep.subr.bf16.mxu0 %v1862_v35  ;;  %1066 = vmatprep.subr.bf16.mxu1 %v1865_v38  ;;  %v1879_v34 = vld [vmem:[#allocation10 + $0x2a8] ss:$12 sps:$4 sm:$0xff]  }
  0x8d   :  { %v1880_v35 = vld [vmem:[#allocation10 + $0x68] ss:$12 sps:$4 sm:$0xff]  }
  0x8e   :  { %v1881_v38 = vld [vmem:[#allocation10 + $0x1e8] ss:$12 sps:$4 sm:$0xff]  }
 0x112   :  { %v201_v44 = vpop.f32.mrf.mxu0  ;;  %v242_v45 = vpop.f32.mrf.mxu1 }
 0x113   :  { %v2183_v46 = vadd.f32 %v201_v44, %v126_v40  ;;  %v2185_v47 = vadd.f32 %v242_v45, %v134_v41  ;;  %v1860_v40 = vld [vmem:[#allocation10 + $0xc0] ss:$12 sps:$4 sm:$0xff]   ;;  %v1867_v44 = vld [vmem:[#allocation10 + $0x2f0] ss:$12 sps:$4 sm:$0xff]  }
 0x114   :  { %v203_v48 = vpop.f32.mrf.mxu0  ;;  %v244_v49 = vpop.f32.mrf.mxu1  ;;  %v1863_v41 = vld [vmem:[#allocation10 + $0x240] ss:$12 sps:$4 sm:$0xff]   ;;  %1026 = vmatpush2.bf16.msra.mxu0 %v1860_v40  ;;  %v1882_v40 = vld [vmem:[#allocation10 + $0x110] ss:$12 sps:$4 sm:$0xff]  }
 0x115   :  { %v2187_v50 = vadd.f32 %v203_v48, %v130_v42  ;;  %v256_v54 = vmul.f32 %v2183_v46, %v2183_v46  ;;  %v258_v55 = vmul.f32 %v2185_v47, %v2185_v47  ;;  %v2198_v60 = vadd.f32 %v244_v49, %v138_v51  ;;  %1067 = vmatpush2.bf16.msra.mxu1 %v1863_v41  ;;  %v1866_v42 = vld [vmem:[#allocation10 + $0x170] ss:$12 sps:$4 sm:$0xff]  }
 0x116   :  { %v205_v52 = vpop.f32.mrf.mxu0  ;;  %v246_v53 = vpop.f32.mrf.mxu1  ;;  %1653 = vmatprep.subr.bf16.mxu0 %v1866_v42  ;;  %1675 = vmatprep.subr.bf16.mxu1 %v1867_v44  ;;  %v1883_v41 = vld [vmem:[#allocation10 + $0x290] ss:$12 sps:$4 sm:$0xff]  }
 0x117   :  { %v257_v56 = vmul.f32 %v2187_v50, %v2187_v50  ;;  %v251_v57 = vadd.f32 %v2187_v50, %v2183_v46  ;;  %v259_v1 = vmul.f32 %v2198_v60, %v2198_v60  ;;  %v1884_v42 = vld [vmem:[#allocation10 + $0x50] ss:$12 sps:$4 sm:$0xff]  }
 0x118   :  { %v206_v58 = vpop.f32.mrf.mxu0  ;;  %v247_v59 = vpop.f32.mrf.mxu1  ;;  %v1885_v44 = vld [vmem:[#allocation10 + $0x1d0] ss:$12 sps:$4 sm:$0xff]  }
 0x119   :  { %v252_v61 = vadd.f32 %v251_v57, %v2185_v47  ;;  %v260_v62 = vadd.f32 %v257_v56, %v256_v54  ;;  %v249_v56 = vld [vmem:[%s2272_s3] sm:$0xf]  ;;  %v250_v57 = vld [vmem:[#allocation8] sm:$0xf] }
 0x11a   :  { %v288_v58 = vrot.slane %v249_v56, %v2176_v39  ;;  %v296_v59 = vrot.slane %v249_v56, %v2181_v43  ;;  %v313_v4 = vrot.slane %v250_v57, %v2176_v39  ;;  %v321_v5 = vrot.slane %v250_v57, %v2181_v43 }
 0x11b   :  { %v253_v63 = vadd.f32 %v252_v61, %v2198_v60  ;;  %v261_v0 = vadd.f32 %v260_v62, %v258_v55  ;;  %v284_v61 = vrot.slane %v249_v56, %v2172_v36  ;;  %v292_v62 = vrot.slane %v249_v56, %v2174_v37  ;;  %v1894_v56 = vld [vmem:[#allocation10 + $0xc8] ss:$12 sps:$4 sm:$0xff]  }
 0x11c   :  { %v309_v6 = vrot.slane %v250_v57, %v2172_v36  ;;  %v317_v7 = vrot.slane %v250_v57, %v2174_v37  ;;  %v1895_v57 = vld [vmem:[#allocation10 + $0x248] ss:$12 sps:$4 sm:$0xff]  }
 0x11d   :  { %254 = vadd.xlane.f32.xlu0 %v253_v63  ;;  %v262_v2 = vadd.f32 %v261_v0, %v259_v1 }
 0x121   :  { %263 = vadd.xlane.f32.xlu0 %v262_v2 }
 0x1a6   :  { %v255_v45 = vpop.xlane.xlu0 %254 }
 0x1a7   :  { %v265_v48 = vmul.f32 0.0025, %v255_v45  ;;  %v1886_v45 = vld [vmem:[#allocation10 + $0xf8] ss:$12 sps:$4 sm:$0xff]  }
 0x1a9   :  { %v267_v51 = vmul.f32 %v265_v48, %v265_v48  ;;  %v270_v63 = vsub.f32 %v2183_v46, %v265_v48  ;;  %v272_v0 = vsub.f32 %v2185_v47, %v265_v48  ;;  %v271_v1 = vsub.f32 %v2187_v50, %v265_v48 }
 0x1aa   :  { %v264_v49 = vpop.xlane.xlu0 %263  ;;  %v273_v2 = vsub.f32 %v2198_v60, %v265_v48  ;;  %v1887_v48 = vld [vmem:[#allocation10 + $0x278] ss:$12 sps:$4 sm:$0xff]  }
 0x1ab   :  { %v266_v52 = vmul.f32 0.0025, %v264_v49  ;;  %v1888_v49 = vld [vmem:[#allocation10 + $0x38] ss:$12 sps:$4 sm:$0xff]  }
 0x1ad   :  { %v268_v53 = vsub.f32 %v266_v52, %v267_v51  ;;  %v1889_v51 = vld [vmem:[#allocation10 + $0x1b8] ss:$12 sps:$4 sm:$0xff]   ;;  %v1890_v52 = vld [vmem:[#allocation10 + $0xe0] ss:$12 sps:$4 sm:$0xff]  }
 0x1af   :  { %v269_v54 = vmax.f32 %v268_v53, 0.0  ;;  %v1891_v53 = vld [vmem:[#allocation10 + $0x260] ss:$12 sps:$4 sm:$0xff]  }
 0x1b1   :  { %v274_v55 = vadd.f32 1e-05, %v269_v54  ;;  %v1892_v54 = vld [vmem:[#allocation10 + $0x20] ss:$12 sps:$4 sm:$0xff]  }
 0x1b3   :  { %1922 = vrsqrt.f32 %v274_v55  ;;  %v1893_v55 = vld [vmem:[#allocation10 + $0x1a0] ss:$12 sps:$4 sm:$0xff]  }
 0x1c0   :  { %v1923_v3 = vpop.eup %1922 }
 0x1c1   :  { %v277_v8 = vmul.f32 %v1923_v3, %v271_v1  ;;  %v279_v9 = vmul.f32 %v1923_v3, %v273_v2  ;;  %v276_v10 = vmul.f32 %v1923_v3, %v270_v63  ;;  %v278_v11 = vmul.f32 %v1923_v3, %v272_v0 }
 0x1c3   :  { %v302_v46 = vmul.f32 %v288_v58, %v277_v8  ;;  %v304_v12 = vmul.f32 %v296_v59, %v279_v9  ;;  %v301_v47 = vmul.f32 %v284_v61, %v276_v10  ;;  %v303_v13 = vmul.f32 %v292_v62, %v278_v11  ;;  %v1896_v58 = vld [vmem:[#allocation10 + $0x8] ss:$12 sps:$4 sm:$0xff]  }
 0x1c4   :  { %v1897_v59 = vld [vmem:[#allocation10 + $0x188] ss:$12 sps:$4 sm:$0xff]  }
 0x1c5   :  { %v327_v50 = vadd.f32 %v313_v4, %v302_v46  ;;  %v329_v14 = vadd.f32 %v321_v5, %v304_v12  ;;  %v326_v60 = vadd.f32 %v309_v6, %v301_v47  ;;  %v328_v15 = vadd.f32 %v317_v7, %v303_v13  ;;  %v466_v5 = vld [vmem:[%s2275_s6] sm:$0x7] }
 0x1c6   :  { %v475_v6 = vrot.slane %v466_v5, %v2176_v39  ;;  %v471_v7 = vrot.slane %v466_v5, %v2172_v36  ;;  %v479_v46 = vrot.slane %v466_v5, %v2174_v37  ;;  %v1158_v5 = vld [vmem:[%s2277_s8] sm:$0x7] }
 0x1c7   :  { %v331_v16 = vmax.f32 %v327_v50, 0.0  ;;  %v333_v17 = vmax.f32 %v329_v14, 0.0  ;;  %v330_v18 = vmax.f32 %v326_v60, 0.0  ;;  %v332_v43 = vmax.f32 %v328_v15, 0.0 }
 0x1c9   :  { %v335_v19 = vpack.c.bf16 %v331_v16, %v331_v16  ;;  %v337_v20 = vpack.c.bf16 %v333_v17, %v333_v17  ;;  %v2219_v21 = vpack.c.bf16 %v330_v18, %v330_v18  ;;  %v2221_v22 = vpack.c.bf16 %v332_v43, %v332_v43 }
 0x1cb   :  { %1027 = vmatprep.mubr.bf16.mxu0 %v335_v19  ;;  %1068 = vmatprep.mubr.bf16.mxu1 %v337_v20 }
 0x1cc   :  { %1028 = vmatmul.mubr.bf16.vlgmr.msra.gmra.mxu0 %v2219_v21  ;;  %1069 = vmatmul.mubr.bf16.vlgmr.msra.gmra.mxu1 %v2221_v22 }
 0x1cd   :  { %1654 = vmatpush3.bf16.msra.mxu0 %v1868_v23  ;;  %1676 = vmatpush3.bf16.msra.mxu1 %v1869_v24 }
 0x1ce   :  { %1109 = vmatprep.mubr.bf16.mxu0 %v335_v19  ;;  %1149 = vmatprep.mubr.bf16.mxu1 %v337_v20 }
 0x1cf   :  { %1655 = vmatprep.subr.bf16.mxu0 %v1870_v25  ;;  %1677 = vmatprep.subr.bf16.mxu1 %v1871_v26 }
 0x1d1   :  { %1656 = vmatpush3.bf16.msra.mxu0 %v1872_v27  ;;  %1678 = vmatpush3.bf16.msra.mxu1 %v1873_v28  ;;  %v1898_v27 = vld [vmem:[#allocation11 + $0x78] sm:$0xff]  }
 0x1d2   :  { %1657 = vmatprep.subr.bf16.mxu0 %v1874_v29  ;;  %1679 = vmatprep.subr.bf16.mxu1 %v1875_v30  ;;  %v1899_v28 = vld [vmem:[#allocation11 + $0xb8] sm:$0xff]   ;;  %v2091_v29 = vmov 0.0  }
 0x1d3   :  { %v1900_v30 = vld [vmem:[#allocation11 + $0x38] sm:$0xff]  }
 0x1d5   :  { %1658 = vmatpush3.bf16.msra.mxu0 %v1876_v31  ;;  %1680 = vmatpush3.bf16.msra.mxu1 %v1877_v32  ;;  %v1901_v31 = vld [vmem:[#allocation11 + $0x70] sm:$0xff]  }
 0x1d6   :  { %1659 = vmatprep.subr.bf16.mxu0 %v1878_v33  ;;  %1681 = vmatprep.subr.bf16.mxu1 %v1879_v34  ;;  %v1902_v32 = vld [vmem:[#allocation11 + $0xb0] sm:$0xff]   ;;  %v1904_v34 = vld [vmem:[#allocation11 + $0x68] sm:$0xff]  }
 0x1d7   :  { %v1903_v33 = vld [vmem:[#allocation11 + $0x30] sm:$0xff]  }
 0x1d9   :  { %1660 = vmatpush3.bf16.msra.mxu0 %v1880_v35  ;;  %1682 = vmatpush3.bf16.msra.mxu1 %v1881_v38  ;;  %v1905_v35 = vld [vmem:[#allocation11 + $0xa8] sm:$0xff]  }
 0x1da   :  { %1661 = vmatprep.subr.bf16.mxu0 %v1882_v40  ;;  %1683 = vmatprep.subr.bf16.mxu1 %v1883_v41  ;;  %v1906_v38 = vld [vmem:[#allocation11 + $0x28] sm:$0xff]   ;;  %v1907_v40 = vld [vmem:[#allocation11 + $0x60] sm:$0xff]  }
 0x1db   :  { %v1908_v41 = vld [vmem:[#allocation11 + $0xa0] sm:$0xff]  }
 0x1dd   :  { %1662 = vmatpush3.bf16.msra.mxu0 %v1884_v42  ;;  %1684 = vmatpush3.bf16.msra.mxu1 %v1885_v44  ;;  %v1909_v42 = vld [vmem:[#allocation11 + $0x20] sm:$0xff]   ;;  %v1910_v44 = vld [vmem:[#allocation11 + $0x58] sm:$0xff]  }
 0x1de   :  { %1663 = vmatprep.subr.bf16.mxu0 %v1886_v45  ;;  %1685 = vmatprep.subr.bf16.mxu1 %v1887_v48  ;;  %v1911_v45 = vld [vmem:[#allocation11 + $0x98] sm:$0xff]  }
 0x1df   :  { %v1912_v48 = vld [vmem:[#allocation11 + $0x18] sm:$0xff]  }
 0x1e1   :  { %1664 = vmatpush3.bf16.msra.mxu0 %v1888_v49  ;;  %1686 = vmatpush3.bf16.msra.mxu1 %v1889_v51  ;;  %v1913_v49 = vld [vmem:[#allocation11 + $0x50] sm:$0xff]  }
 0x1e2   :  { %1665 = vmatprep.subr.bf16.mxu0 %v1890_v52  ;;  %1687 = vmatprep.subr.bf16.mxu1 %v1891_v53  ;;  %v1914_v51 = vld [vmem:[#allocation11 + $0x90] sm:$0xff]   ;;  %v1916_v53 = vld [vmem:[#allocation11 + $0x48] sm:$0xff]  }
 0x1e3   :  { %v1915_v52 = vld [vmem:[#allocation11 + $0x10] sm:$0xff]  }
 0x1e5   :  { %1666 = vmatpush3.bf16.msra.mxu0 %v1892_v54  ;;  %1688 = vmatpush3.bf16.msra.mxu1 %v1893_v55  ;;  %v1917_v54 = vld [vmem:[#allocation11 + $0x88] sm:$0xff]  }
 0x1e6   :  { %1667 = vmatprep.subr.bf16.mxu0 %v1894_v56  ;;  %1689 = vmatprep.subr.bf16.mxu1 %v1895_v57  ;;  %v1918_v55 = vld [vmem:[#allocation11 + $0x8] sm:$0xff]   ;;  %v1919_v56 = vld [vmem:[#allocation11 + $0x40] sm:$0xff]  }
 0x1e7   :  { %v1920_v57 = vld [vmem:[#allocation11 + $0x80] sm:$0xff]  }
 0x1e9   :  { %1668 = vmatpush3.bf16.msra.mxu0 %v1896_v58  ;;  %1690 = vmatpush3.bf16.msra.mxu1 %v1897_v59  ;;  %v1921_v58 = vld [vmem:[#allocation11] sm:$0xff]  }
 0x1ea   :  { %1728 = vmatprep.subr.bf16.mxu1 %v2091_v29  ;;  %1697 = vmatprep.subr.bf16.mxu0 %v1898_v27 }
 0x1ec   :  { %1110 = vmatmul.mubr.bf16.vlgmr.msra.gmra.mxu0 %v2219_v21  ;;  %1150 = vmatmul.mubr.bf16.vlgmr.msra.gmra.mxu1 %v2221_v22 }
 0x1ed   :  { %1729 = vmatpush3.bf16.msra.mxu1 %v1899_v28  ;;  %1698 = vmatpush3.bf16.msra.mxu0 %v1900_v30 }
 0x1ee   :  { %1730 = vmatprep.subr.bf16.mxu1 %v2091_v29  ;;  %1699 = vmatprep.subr.bf16.mxu0 %v1901_v31 }
 0x1ef   :  { %1744 = vmatprep.mubr.msk.bf16.mxu1 %vm2092_vm1, %v2091_v29 }
 0x1f1   :  { %1731 = vmatpush3.bf16.msra.mxu1 %v1902_v32  ;;  %1700 = vmatpush3.bf16.msra.mxu0 %v1903_v33 }
 0x1f2   :  { %1732 = vmatprep.subr.bf16.mxu1 %v2091_v29  ;;  %1701 = vmatprep.subr.bf16.mxu0 %v1904_v34 }
 0x1f5   :  { %1733 = vmatpush3.bf16.msra.mxu1 %v1905_v35  ;;  %1702 = vmatpush3.bf16.msra.mxu0 %v1906_v38 }
 0x1f6   :  { %1734 = vmatprep.subr.bf16.mxu1 %v2091_v29  ;;  %1703 = vmatprep.subr.bf16.mxu0 %v1907_v40 }
 0x1f9   :  { %1735 = vmatpush3.bf16.msra.mxu1 %v1908_v41  ;;  %1704 = vmatpush3.bf16.msra.mxu0 %v1909_v42 }
 0x1fa   :  { %1736 = vmatprep.subr.bf16.mxu1 %v2091_v29  ;;  %1705 = vmatprep.subr.bf16.mxu0 %v1910_v44 }
 0x1fd   :  { %1737 = vmatpush3.bf16.msra.mxu1 %v1911_v45  ;;  %1706 = vmatpush3.bf16.msra.mxu0 %v1912_v48 }
 0x1fe   :  { %1738 = vmatprep.subr.bf16.mxu1 %v2091_v29  ;;  %1707 = vmatprep.subr.bf16.mxu0 %v1913_v49 }
 0x201   :  { %1739 = vmatpush3.bf16.msra.mxu1 %v1914_v51  ;;  %1708 = vmatpush3.bf16.msra.mxu0 %v1915_v52 }
 0x202   :  { %1740 = vmatprep.subr.bf16.mxu1 %v2091_v29  ;;  %1709 = vmatprep.subr.bf16.mxu0 %v1916_v53 }
 0x205   :  { %1741 = vmatpush3.bf16.msra.mxu1 %v1917_v54  ;;  %1710 = vmatpush3.bf16.msra.mxu0 %v1918_v55 }
 0x206   :  { %1742 = vmatprep.subr.bf16.mxu1 %v2091_v29  ;;  %1711 = vmatprep.subr.bf16.mxu0 %v1919_v56 }
 0x209   :  { %1743 = vmatpush3.bf16.msra.mxu1 %v1920_v57  ;;  %1712 = vmatpush3.bf16.msra.mxu0 %v1921_v58 }
 0x28c   :  { %v1029_v61 = vpop.f32.mrf.mxu0  ;;  %v1070_v62 = vpop.f32.mrf.mxu1 }
 0x28d   :  { %v1030_v11 = vadd.f32 %v1029_v61, %v471_v7 }
 0x28e   :  { %v1031_v63 = vpop.f32.mrf.mxu0  ;;  %v1072_v0 = vpop.f32.mrf.mxu1 }
 0x28f   :  { %v1032_v8 = vadd.f32 %v1031_v63, %v475_v6  ;;  %v2235_v15 = vadd.f32 %v1070_v62, %v1030_v11 }
 0x290   :  { %v1033_v1 = vpop.f32.mrf.mxu0  ;;  %v1074_v2 = vpop.f32.mrf.mxu1 }
 0x291   :  { %v2233_v13 = vadd.f32 %v1072_v0, %v1032_v8  ;;  %v1163_v22 = vmul.f32 %v2235_v15, %v2235_v15 }
 0x292   :  { %v1034_v3 = vpop.f32.mrf.mxu0  ;;  %v1075_v4 = vpop.f32.mrf.mxu1 }
 0x293   :  { %v1164_v19 = vmul.f32 %v2233_v13, %v2233_v13  ;;  %v1159_v21 = vadd.f32 %v2233_v13, %v2235_v15  ;;  %v1157_v4 = vld [vmem:[%s2276_s7] sm:$0x7] }
 0x294   :  { %v1191_v6 = vrot.slane %v1157_v4, %v2176_v39  ;;  %v1195_v7 = vrot.slane %v1157_v4, %v2174_v37  ;;  %v1187_v11 = vrot.slane %v1157_v4, %v2172_v36 }
 0x295   :  { %v1166_v25 = vadd.f32 %v1164_v19, %v1163_v22 }
 0x2ac   :  { %v1669_v9 = vpop.f32.mrf.mxu0  ;;  %v1691_v10 = vpop.f32.mrf.mxu1 }
 0x2ae   :  { %v1670_v12 = vpop.f32.mrf.mxu0  ;;  %v1692_v47 = vpop.f32.mrf.mxu1 }
 0x2af   :  { %v1671_v50 = vadd.f32 %v1670_v12, %v1669_v9  ;;  %v1693_v17 = vadd.f32 %v1692_v47, %v1691_v10  ;;  %v1210_v12 = vrot.slane %v1158_v5, %v2176_v39  ;;  %v1214_v47 = vrot.slane %v1158_v5, %v2174_v37 }
 0x2b0   :  { %v1672_v14 = vpop.f32.mrf.mxu0  ;;  %v1694_v60 = vpop.f32.mrf.mxu1 }
 0x2b1   :  { %v1112_v16 = vadd.f32 %v1671_v50, %v479_v46 }
 0x2b2   :  { %v1673_v18 = vpop.f32.mrf.mxu0  ;;  %v1695_v43 = vpop.f32.mrf.mxu1 }
 0x2b3   :  { %v2239_v20 = vadd.f32 %v1693_v17, %v1112_v16  ;;  %v1206_v16 = vrot.slane %v1158_v5, %v2172_v36  ;;  %v1628_v36 = vld [vmem:[%s2279_s10] ss:$0 sm:$0xff] }
 0x2b5   :  { %v1160_v23 = vadd.f32 %v1159_v21, %v2239_v20  ;;  %v1165_v24 = vmul.f32 %v2239_v20, %v2239_v20 }
 0x2b7   :  { %1161 = vadd.xlane.f32.xlu1 %v1160_v23  ;;  %v1167_v26 = vadd.f32 %v1166_v25, %v1165_v24 }
 0x2bb   :  { %1168 = vadd.xlane.f32.xlu1 %v1167_v26 }
 0x340   :  { %v1162_v59 = vpop.xlane.xlu1 %1161 }
 0x341   :  { %v1170_v61 = vmul.f32 0.0033333334, %v1162_v59 }
 0x343   :  { %v1172_v63 = vmul.f32 %v1170_v61, %v1170_v61  ;;  %v1175_v8 = vsub.f32 %v2235_v15, %v1170_v61  ;;  %v1176_v9 = vsub.f32 %v2233_v13, %v1170_v61  ;;  %v1177_v10 = vsub.f32 %v2239_v20, %v1170_v61 }
 0x344   :  { %v1169_v62 = vpop.xlane.xlu1 %1168 }
 0x345   :  { %v1171_v0 = vmul.f32 0.0033333334, %v1169_v62 }
 0x347   :  { %v1173_v1 = vsub.f32 %v1171_v0, %v1172_v63 }
 0x349   :  { %v1174_v2 = vmax.f32 %v1173_v1, 0.0 }
 0x34b   :  { %v1178_v3 = vadd.f32 1e-05, %v1174_v2 }
 0x34d   :  { %1924 = vrsqrt.f32 %v1178_v3 }
 0x35a   :  { %v1925_v46 = vpop.eup %1924 }
 0x35b   :  { %v1181_v50 = vmul.f32 %v1925_v46, %v1176_v9  ;;  %v1182_v14 = vmul.f32 %v1925_v46, %v1177_v10  ;;  %v1180_v60 = vmul.f32 %v1925_v46, %v1175_v8 }
 0x35d   :  { %v1200_v17 = vmul.f32 %v1191_v6, %v1181_v50  ;;  %v1201_v18 = vmul.f32 %v1195_v7, %v1182_v14  ;;  %v1199_v43 = vmul.f32 %v1187_v11, %v1180_v60 }
 0x35f   :  { %v1219_v15 = vadd.f32 %v1210_v12, %v1200_v17  ;;  %v1220_v19 = vadd.f32 %v1214_v47, %v1201_v18  ;;  %v1218_v13 = vadd.f32 %v1206_v16, %v1199_v43 }
 0x361   :  { %v1222_v21 = vmax.f32 %v1219_v15, 0.0  ;;  %v1223_v20 = vmax.f32 %v1220_v19, 0.0  ;;  %v1221_v22 = vmax.f32 %v1218_v13, 0.0 }
 0x363   :  { %v1225_v23 = vpack.c.bf16 %v1222_v21, %v1222_v21  ;;  %v1226_v24 = vpack.c.bf16 %v1223_v20, %v1223_v20  ;;  %v1224_v25 = vpack.c.bf16 %v1221_v22, %v1221_v22 }
 0x365   :  { %1458 = vmatprep.mubr.bf16.mxu0 %v1225_v23  ;;  %1745 = vmatmul.mubr.bf16.vlgmr.msra.gmra.mxu1 %v1226_v24 }
 0x366   :  { %1459 = vmatmul.mubr.bf16.vlgmr.msra.gmra.mxu0 %v1224_v25 }
 0x425   :  { %v1500_v37 = vpop.f32.mrf.mxu1 }
 0x426   :  { %v1713_v39 = vpop.f32.mrf.mxu0 }
 0x427   :  { %v1746_v26 = vpop.f32.mrf.mxu1 }
 0x428   :  { %v1714_v27 = vpop.f32.mrf.mxu0 }
 0x429   :  { %v1715_v28 = vadd.f32 %v1714_v27, %v1713_v39  ;;  %v1503_v29 = vpop.f32.mrf.mxu1 }
 0x42a   :  { %v1716_v30 = vpop.f32.mrf.mxu0 }
 0x42b   :  { %v1461_v31 = vadd.f32 %v1715_v28, %v1628_v36  ;;  %v1747_v32 = vpop.f32.mrf.mxu1 }
 0x42c   :  { %v1717_v33 = vpop.f32.mrf.mxu0 }
 0x42d   :  { %v1501_v34 = vadd.f32 %v1500_v37, %v1461_v31 }
 0x42f   :  { %1926 = vtanh.f32 %v1501_v34 }
 0x43c   :  { %v1927_v35 = vpop.eup %1926 }
 0x43d   :  { %1507 = vst [vmem:[#allocation13] sm:$0xff] %v1927_v35 }
 0x43e   :  { %2059 = shalt.err (!%p2056_p6)
}
 0x43f   :  { %1517 = dma.vmem_to_hbm [thread:$0]  %s1515_s15, 128, %s2280_s11, [#allocation4]  }
 0x440   :  { %2076 = dma.done.wait [#allocation4], 128  }
 0x441   :  { %2077 = vsyncadd [#allocation4], 4294967168 }
 0x442   :  { %1521 = vsyncpa [#allocation3], 1 }
 0x443   :  { %1522 = vsyncpa [#allocation6], 1 }
 0x444   :  { %1523 = vsyncpa [#allocation9], 1 }
 0x445   :  { %1524 = vsyncpa [#allocation12], 1 }
 0x446   :  { %1525 = vsyncpa [#allocation4], 1 }

</bundles_post_ra>
